<compile_context>
chip_gen: v7x
topology: tpu7x:2x2x1
jax: 0.10.0
libtpu: 0.0.40
codegen_flags: <defaults>
</compile_context>

<pallas_src>
import functools

import jax
import jax.numpy as jnp
from jax.experimental import pallas as pl
from jax.experimental.pallas import tpu as pltpu


def _round_up(x, m):
    return ((x + m - 1) // m) * m


# ---------------------------------------------------------------------------
# Kernel
# ---------------------------------------------------------------------------
def _encoder_kernel(*refs, num_layers):
    """Fully fused MLP encoder.

    refs = (x_ref, w_0, ..., w_{L-1}, b_all_ref, out_ref), L = num_layers.
    Layer i computes y = h @ w_i + b_all[i]; ReLU on every layer except the
    last (the fused mean||log_var head).  Matmuls use bf16 operands with f32
    accumulation; the bias/activation epilogue is f32.
    """
    x_ref = refs[0]
    out_ref = refs[-1]
    b_ref = refs[-2]
    w_refs = refs[1:1 + num_layers]

    h = x_ref[...].astype(jnp.bfloat16)
    y = None
    for i in range(num_layers):
        w = w_refs[i][...]
        out_w = w.shape[1]
        y = jnp.dot(h, w, preferred_element_type=jnp.float32)
        y = y + b_ref[i:i + 1, :out_w]          # (1, out_w) broadcasts over rows
        if i < num_layers - 1:
            h = jnp.maximum(y, 0.0).astype(jnp.bfloat16)
    out_ref[...] = y.astype(out_ref.dtype)


# ---------------------------------------------------------------------------
# Parameter construction / one-time packing
# ---------------------------------------------------------------------------
def init_encoder_params(key, enc_dim, input_dim, latent_dim, node_count):
    """nn.Linear-style init (uniform +/- 1/sqrt(fan_in)).  Weights are stored
    as [in_features, out_features] so the kernel computes y = x @ W + b."""
    def make_linear(k, fan_in, fan_out):
        kw, kb = jax.random.split(k)
        bound = 1.0 / jnp.sqrt(jnp.float32(fan_in))
        w = jax.random.uniform(kw, (fan_in, fan_out), jnp.float32, -bound, bound)
        b = jax.random.uniform(kb, (1, fan_out), jnp.float32, -bound, bound)
        return w, b

    keys = jax.random.split(key, enc_dim + 3)
    params = {"input": make_linear(keys[0], input_dim, node_count)}
    for i in range(enc_dim):
        params[f"enc_{i + 1}"] = make_linear(keys[1 + i], node_count, node_count)
    params["mean"] = make_linear(keys[enc_dim + 1], node_count, latent_dim)
    params["var"] = make_linear(keys[enc_dim + 2], node_count, latent_dim)
    return params


def pack_encoder_params(params, enc_dim, *, weight_dtype=jnp.bfloat16):
    """One-time packing: pad feature dims to lane multiples (128), fuse the
    mean/var heads into a single matmul, consolidate all biases into one
    (num_layers, maxw) f32 array, and cast weights to bf16 for the MXU.
    Zero padding keeps the numerics exact (padded cols: weight 0, bias 0)."""
    lane = 128
    input_dim = params["input"][0].shape[0]
    node_count = params["input"][0].shape[1]
    latent_dim = params["mean"][0].shape[1]
    node_p = _round_up(node_count, lane)
    head_out = 2 * latent_dim
    head_p = _round_up(head_out, lane)
    maxw = max(node_p, head_p)

    def pad2(a, rows, cols):
        return jnp.pad(a, ((0, rows - a.shape[0]), (0, cols - a.shape[1])))

    weights, biases = [], []
    w, b = params["input"]
    weights.append(pad2(w, input_dim, node_p))
    biases.append(pad2(b, 1, maxw))
    for i in range(enc_dim):
        w, b = params[f"enc_{i + 1}"]
        weights.append(pad2(w, node_p, node_p))
        biases.append(pad2(b, 1, maxw))
    wm, bm = params["mean"]
    wv, bv = params["var"]
    weights.append(pad2(jnp.concatenate([wm, wv], axis=1), node_p, head_p))
    biases.append(pad2(jnp.concatenate([bm, bv], axis=1), 1, maxw))

    weights = tuple(w.astype(weight_dtype) for w in weights)
    b_all = jnp.concatenate(biases, axis=0).astype(jnp.float32)    # (L, maxw)

    meta = dict(input_dim=input_dim, latent_dim=latent_dim,
                node_p=node_p, head_p=head_p, num_layers=len(weights))
    return {"weights": weights, "b_all": b_all, "meta": meta}


# ---------------------------------------------------------------------------
# Forward
# ---------------------------------------------------------------------------
def _choose_batch_tiling(batch, max_batch_tile):
    """Pick a batch tile that minimises padding and gives >= 2 grid steps when
    batch > 8, so v7x's second TensorCore gets work ('parallel' grid axis)."""
    min_tiles = 2 if batch > 8 else 1
    num_tiles = max(pl.cdiv(batch, max_batch_tile), min_tiles)
    tb = _round_up(pl.cdiv(batch, num_tiles), 8)
    num_tiles = pl.cdiv(batch, tb)
    return tb, num_tiles


def encoder_forward(packed, x, *, max_batch_tile=512):
    """Fused encoder forward.  Returns (mean, log_var), each [batch, latent]."""
    weights = packed["weights"]
    b_all = packed["b_all"]
    meta = packed["meta"]
    input_dim = meta["input_dim"]
    latent_dim = meta["latent_dim"]
    node_p = meta["node_p"]
    head_p = meta["head_p"]
    num_layers = meta["num_layers"]

    batch = x.shape[0]
    assert x.shape[1] == input_dim

    tb, num_tiles = _choose_batch_tiling(batch, max_batch_tile)
    batch_p = tb * num_tiles
    x_p = x if batch_p == batch else jnp.pad(x, ((0, batch_p - batch), (0, 0)))

    # VMEM budget: resident weights/biases (x2 in case the single-buffer
    # request falls back to double-buffering) + in/out tiles + headroom.
    weight_bytes = sum(int(w.size) * w.dtype.itemsize for w in weights)
    bias_bytes = int(b_all.size) * b_all.dtype.itemsize
    tile_bytes = tb * max(input_dim, node_p, head_p) * 4
    if 2 * (weight_bytes + bias_bytes) > (48 << 20):
        # TODO(synk): add a tiled fallback (grid over node_count, or
        # pltpu.emit_pipeline over K/N inside the kernel) so very large
        # node_count configs fit v7x's 64 MiB VMEM.
        raise NotImplementedError("encoder weights too large for resident-VMEM kernel")
    needed = 2 * (weight_bytes + bias_bytes) + 4 * tile_bytes + (8 << 20)
    vmem_limit = int(min(64 << 20, max(needed, 32 << 20)))

    kernel = functools.partial(_encoder_kernel, num_layers=num_layers)

    def build(single_buffer_consts):
        def const_spec(shape):
            if single_buffer_consts:
                return pl.BlockSpec(shape, lambda i: (0, 0),
                                    pipeline_mode=pl.Buffered(1))
            return pl.BlockSpec(shape, lambda i: (0, 0))

        in_specs = [pl.BlockSpec((tb, input_dim), lambda i: (i, 0))]
        in_specs += [const_spec(w.shape) for w in weights]
        in_specs.append(const_spec(b_all.shape))
        return pl.pallas_call(
            kernel,
            out_shape=jax.ShapeDtypeStruct((batch_p, head_p), jnp.float32),
            grid=(num_tiles,),
            in_specs=in_specs,
            out_specs=pl.BlockSpec((tb, head_p), lambda i: (i, 0)),
            compiler_params=pltpu.CompilerParams(
                dimension_semantics=("parallel",),
                vmem_limit_bytes=vmem_limit,
            ),
        )

    try:
        out = build(True)(x_p, *weights, b_all)
        out = jax.block_until_ready(out)
    except Exception:
        # pl.Buffered(1) not supported by this jax/Mosaic build: default buffering.
        out = build(False)(x_p, *weights, b_all)

    mean = out[:batch, :latent_dim]
    log_var = out[:batch, latent_dim:2 * latent_dim]
    return mean, log_var


# ---------------------------------------------------------------------------
if __name__ == "__main__":
    enc_dim = 2        # number of hidden enc_i layers
    input_dim = 32
    latent_dim = 16
    node_count = 64
    batch = 32         # > 8 -> two batch tiles -> exercises the "parallel" grid

    key = jax.random.PRNGKey(0)
    kp, kx = jax.random.split(key)
    params = init_encoder_params(kp, enc_dim, input_dim, latent_dim, node_count)
    packed = pack_encoder_params(params, enc_dim)       # one-time packing
    x = jax.random.normal(kx, (batch, input_dim), jnp.float32)

    mean, log_var = encoder_forward(packed, x)
    jax.block_until_ready((mean, log_var))

    # Reference (plain JAX, f32).  The kernel uses bf16 matmul operands with
    # f32 accumulation, so tolerances are loosened accordingly.
    def ref_forward(params, x):
        def lin(h, wb):
            w, b = wb
            return h @ w + b
        h = jnp.maximum(lin(x, params["input"]), 0.0)
        for i in range(enc_dim):
            h = jnp.maximum(lin(h, params[f"enc_{i + 1}"]), 0.0)
        return lin(h, params["mean"]), lin(h, params["var"])

    mean_ref, log_var_ref = ref_forward(params, x)
    assert mean.shape == (batch, latent_dim) and log_var.shape == (batch, latent_dim)
    assert jnp.allclose(mean, mean_ref, atol=2e-2, rtol=2e-2), \
        float(jnp.max(jnp.abs(mean - mean_ref)))
    assert jnp.allclose(log_var, log_var_ref, atol=2e-2, rtol=2e-2), \
        float(jnp.max(jnp.abs(log_var - log_var_ref)))

    # TODO(synk): `activate` is an arbitrary callable in the PyTorch module; ReLU is
    # hard-coded here.  generator()/eval()/no_grad() are host-side, not kernel work.
    print("KERNEL_OK")
</pallas_src>

<mosaic_0001>
module attributes {stable_mosaic.version = 11 : i64} {
  func.func @_encoder_kernel(%arg0: i32, %arg1: memref<16x32xf32, #tpu.memory_space<vmem>>, %arg2: memref<32x128xbf16, #tpu.memory_space<vmem>>, %arg3: memref<128x128xbf16, #tpu.memory_space<vmem>>, %arg4: memref<128x128xbf16, #tpu.memory_space<vmem>>, %arg5: memref<128x128xbf16, #tpu.memory_space<vmem>>, %arg6: memref<4x128xf32, #tpu.memory_space<vmem>>, %arg7: memref<16x128xf32, #tpu.memory_space<vmem>>) attributes {dimension_semantics = [#tpu.dimension_semantics<parallel>], iteration_bounds = array<i64: 2>, scalar_prefetch = 0 : i64, scratch_operands = 0 : i64, tpu.core_type = #tpu.core_type<tc>, window_params = [{transform_indices = @transform_0, window_bounds = array<i64: 16, 32>}, {pipeline_mode = #tpu.pipeline_mode<synchronous>, transform_indices = @transform_1, window_bounds = array<i64: 32, 128>}, {pipeline_mode = #tpu.pipeline_mode<synchronous>, transform_indices = @transform_2, window_bounds = array<i64: 128, 128>}, {pipeline_mode = #tpu.pipeline_mode<synchronous>, transform_indices = @transform_3, window_bounds = array<i64: 128, 128>}, {pipeline_mode = #tpu.pipeline_mode<synchronous>, transform_indices = @transform_4, window_bounds = array<i64: 128, 128>}, {pipeline_mode = #tpu.pipeline_mode<synchronous>, transform_indices = @transform_5, window_bounds = array<i64: 4, 128>}, {transform_indices = @transform_6, window_bounds = array<i64: 16, 128>}]} {
    %c0 = arith.constant 0 : index
    %c0_0 = arith.constant 0 : index
    %0 = vector.load %arg1[%c0, %c0_0] : memref<16x32xf32, #tpu.memory_space<vmem>>, vector<16x32xf32>
    %1 = arith.truncf %0 : vector<16x32xf32> to vector<16x32xbf16>
    %c0_1 = arith.constant 0 : index
    %c0_2 = arith.constant 0 : index
    %2 = vector.load %arg2[%c0_1, %c0_2] : memref<32x128xbf16, #tpu.memory_space<vmem>>, vector<32x128xbf16>
    %cst = arith.constant dense<0.000000e+00> : vector<16x128xf32>
    %3 = tpu.matmul %1, %2, %cst {dimension_numbers = #tpu.dot_dimension_numbers<[1], [0], [0], [1], [0, 0, 1, 1], [], []>} : vector<16x32xbf16>, vector<32x128xbf16>, vector<16x128xf32> -> vector<16x128xf32>
    %c0_3 = arith.constant 0 : index
    %c0_4 = arith.constant 0 : index
    %4 = vector.load %arg6[%c0_3, %c0_4] : memref<4x128xf32, #tpu.memory_space<vmem>>, vector<1x128xf32>
    %5 = vector.broadcast %4 : vector<1x128xf32> to vector<16x128xf32>
    %6 = arith.addf %3, %5 : vector<16x128xf32>
    %cst_5 = arith.constant 0.000000e+00 : f32
    %7 = vector.broadcast %cst_5 : f32 to vector<16x128xf32>
    %8 = arith.maximumf %6, %7 : vector<16x128xf32>
    %9 = arith.truncf %8 : vector<16x128xf32> to vector<16x128xbf16>
    %c0_6 = arith.constant 0 : index
    %c0_7 = arith.constant 0 : index
    %10 = vector.load %arg3[%c0_6, %c0_7] : memref<128x128xbf16, #tpu.memory_space<vmem>>, vector<128x128xbf16>
    %cst_8 = arith.constant dense<0.000000e+00> : vector<16x128xf32>
    %11 = tpu.matmul %9, %10, %cst_8 {dimension_numbers = #tpu.dot_dimension_numbers<[1], [0], [0], [1], [0, 0, 1, 1], [], []>} : vector<16x128xbf16>, vector<128x128xbf16>, vector<16x128xf32> -> vector<16x128xf32>
    %c1 = arith.constant 1 : index
    %c0_9 = arith.constant 0 : index
    %12 = vector.load %arg6[%c1, %c0_9] : memref<4x128xf32, #tpu.memory_space<vmem>>, vector<1x128xf32>
    %13 = vector.broadcast %12 : vector<1x128xf32> to vector<16x128xf32>
    %14 = arith.addf %11, %13 : vector<16x128xf32>
    %cst_10 = arith.constant 0.000000e+00 : f32
    %15 = vector.broadcast %cst_10 : f32 to vector<16x128xf32>
    %16 = arith.maximumf %14, %15 : vector<16x128xf32>
    %17 = arith.truncf %16 : vector<16x128xf32> to vector<16x128xbf16>
    %c0_11 = arith.constant 0 : index
    %c0_12 = arith.constant 0 : index
    %18 = vector.load %arg4[%c0_11, %c0_12] : memref<128x128xbf16, #tpu.memory_space<vmem>>, vector<128x128xbf16>
    %cst_13 = arith.constant dense<0.000000e+00> : vector<16x128xf32>
    %19 = tpu.matmul %17, %18, %cst_13 {dimension_numbers = #tpu.dot_dimension_numbers<[1], [0], [0], [1], [0, 0, 1, 1], [], []>} : vector<16x128xbf16>, vector<128x128xbf16>, vector<16x128xf32> -> vector<16x128xf32>
    %c2 = arith.constant 2 : index
    %c0_14 = arith.constant 0 : index
    %20 = vector.load %arg6[%c2, %c0_14] : memref<4x128xf32, #tpu.memory_space<vmem>>, vector<1x128xf32>
    %21 = vector.broadcast %20 : vector<1x128xf32> to vector<16x128xf32>
    %22 = arith.addf %19, %21 : vector<16x128xf32>
    %cst_15 = arith.constant 0.000000e+00 : f32
    %23 = vector.broadcast %cst_15 : f32 to vector<16x128xf32>
    %24 = arith.maximumf %22, %23 : vector<16x128xf32>
    %25 = arith.truncf %24 : vector<16x128xf32> to vector<16x128xbf16>
    %c0_16 = arith.constant 0 : index
    %c0_17 = arith.constant 0 : index
    %26 = vector.load %arg5[%c0_16, %c0_17] : memref<128x128xbf16, #tpu.memory_space<vmem>>, vector<128x128xbf16>
    %cst_18 = arith.constant dense<0.000000e+00> : vector<16x128xf32>
    %27 = tpu.matmul %25, %26, %cst_18 {dimension_numbers = #tpu.dot_dimension_numbers<[1], [0], [0], [1], [0, 0, 1, 1], [], []>} : vector<16x128xbf16>, vector<128x128xbf16>, vector<16x128xf32> -> vector<16x128xf32>
    %c3 = arith.constant 3 : index
    %c0_19 = arith.constant 0 : index
    %28 = vector.load %arg6[%c3, %c0_19] : memref<4x128xf32, #tpu.memory_space<vmem>>, vector<1x128xf32>
    %29 = vector.broadcast %28 : vector<1x128xf32> to vector<16x128xf32>
    %30 = arith.addf %27, %29 : vector<16x128xf32>
    %c0_20 = arith.constant 0 : index
    %c0_21 = arith.constant 0 : index
    %31 = vector.load %arg7[%c0_20, %c0_21] : memref<16x128xf32, #tpu.memory_space<vmem>>, vector<16x128xf32>
    tpu.vector_store %arg7[%c0_20, %c0_21], %30 {strides = array<i32>} : memref<16x128xf32, #tpu.memory_space<vmem>>, vector<16x128xf32>,
    return
  }
  func.func @transform_0(%arg0: i32) -> (i32, i32) {
    %c0_i32 = arith.constant 0 : i32
    %c0_i32_0 = arith.constant 0 : i32
    return %arg0, %c0_i32 : i32, i32
  }
  func.func @transform_1(%arg0: i32) -> (i32, i32) {
    %c0_i32 = arith.constant 0 : i32
    %c0_i32_0 = arith.constant 0 : i32
    %c0_i32_1 = arith.constant 0 : i32
    return %c0_i32, %c0_i32_0 : i32, i32
  }
  func.func @transform_2(%arg0: i32) -> (i32, i32) {
    %c0_i32 = arith.constant 0 : i32
    %c0_i32_0 = arith.constant 0 : i32
    %c0_i32_1 = arith.constant 0 : i32
    return %c0_i32, %c0_i32_0 : i32, i32
  }
  func.func @transform_3(%arg0: i32) -> (i32, i32) {
    %c0_i32 = arith.constant 0 : i32
    %c0_i32_0 = arith.constant 0 : i32
    %c0_i32_1 = arith.constant 0 : i32
    return %c0_i32, %c0_i32_0 : i32, i32
  }
  func.func @transform_4(%arg0: i32) -> (i32, i32) {
    %c0_i32 = arith.constant 0 : i32
    %c0_i32_0 = arith.constant 0 : i32
    %c0_i32_1 = arith.constant 0 : i32
    return %c0_i32, %c0_i32_0 : i32, i32
  }
  func.func @transform_5(%arg0: i32) -> (i32, i32) {
    %c0_i32 = arith.constant 0 : i32
    %c0_i32_0 = arith.constant 0 : i32
    %c0_i32_1 = arith.constant 0 : i32
    return %c0_i32, %c0_i32_0 : i32, i32
  }
  func.func @transform_6(%arg0: i32) -> (i32, i32) {
    %c0_i32 = arith.constant 0 : i32
    %c0_i32_0 = arith.constant 0 : i32
    return %arg0, %c0_i32 : i32, i32
  }
}

module attributes {stable_mosaic.version = 11 : i64} {
  func.func @_encoder_kernel(%arg0: i32, %arg1: memref<16x32xf32, #tpu.memory_space<vmem>>, %arg2: memref<32x128xbf16, #tpu.memory_space<vmem>>, %arg3: memref<128x128xbf16, #tpu.memory_space<vmem>>, %arg4: memref<128x128xbf16, #tpu.memory_space<vmem>>, %arg5: memref<128x128xbf16, #tpu.memory_space<vmem>>, %arg6: memref<4x128xf32, #tpu.memory_space<vmem>>, %arg7: memref<16x128xf32, #tpu.memory_space<vmem>>) attributes {dimension_semantics = [#tpu.dimension_semantics<parallel>], iteration_bounds = array<i64: 2>, scalar_prefetch = 0 : i64, scratch_operands = 0 : i64, tpu.core_type = #tpu.core_type<tc>, window_params = [{transform_indices = @transform_0, window_bounds = array<i64: 16, 32>}, {pipeline_mode = #tpu.pipeline_mode<synchronous>, transform_indices = @transform_1, window_bounds = array<i64: 32, 128>}, {pipeline_mode = #tpu.pipeline_mode<synchronous>, transform_indices = @transform_2, window_bounds = array<i64: 128, 128>}, {pipeline_mode = #tpu.pipeline_mode<synchronous>, transform_indices = @transform_3, window_bounds = array<i64: 128, 128>}, {pipeline_mode = #tpu.pipeline_mode<synchronous>, transform_indices = @transform_4, window_bounds = array<i64: 128, 128>}, {pipeline_mode = #tpu.pipeline_mode<synchronous>, transform_indices = @transform_5, window_bounds = array<i64: 4, 128>}, {transform_indices = @transform_6, window_bounds = array<i64: 16, 128>}]} {
    %c0 = arith.constant 0 : index
    %c0_0 = arith.constant 0 : index
    %0 = vector.load %arg1[%c0, %c0_0] : memref<16x32xf32, #tpu.memory_space<vmem>>, vector<16x32xf32>
    %1 = arith.truncf %0 : vector<16x32xf32> to vector<16x32xbf16>
    %c0_1 = arith.constant 0 : index
    %c0_2 = arith.constant 0 : index
    %2 = vector.load %arg2[%c0_1, %c0_2] : memref<32x128xbf16, #tpu.memory_space<vmem>>, vector<32x128xbf16>
    %cst = arith.constant dense<0.000000e+00> : vector<16x128xf32>
    %3 = tpu.matmul %1, %2, %cst {dimension_numbers = #tpu.dot_dimension_numbers<[1], [0], [0], [1], [0, 0, 1, 1], [], []>} : vector<16x32xbf16>, vector<32x128xbf16>, vector<16x128xf32> -> vector<16x128xf32>
    %c0_3 = arith.constant 0 : index
    %c0_4 = arith.constant 0 : index
    %4 = vector.load %arg6[%c0_3, %c0_4] : memref<4x128xf32, #tpu.memory_space<vmem>>, vector<1x128xf32>
    %5 = vector.broadcast %4 : vector<1x128xf32> to vector<16x128xf32>
    %6 = arith.addf %3, %5 : vector<16x128xf32>
    %cst_5 = arith.constant 0.000000e+00 : f32
    %7 = vector.broadcast %cst_5 : f32 to vector<16x128xf32>
    %8 = arith.maximumf %6, %7 : vector<16x128xf32>
    %9 = arith.truncf %8 : vector<16x128xf32> to vector<16x128xbf16>
    %c0_6 = arith.constant 0 : index
    %c0_7 = arith.constant 0 : index
    %10 = vector.load %arg3[%c0_6, %c0_7] : memref<128x128xbf16, #tpu.memory_space<vmem>>, vector<128x128xbf16>
    %cst_8 = arith.constant dense<0.000000e+00> : vector<16x128xf32>
    %11 = tpu.matmul %9, %10, %cst_8 {dimension_numbers = #tpu.dot_dimension_numbers<[1], [0], [0], [1], [0, 0, 1, 1], [], []>} : vector<16x128xbf16>, vector<128x128xbf16>, vector<16x128xf32> -> vector<16x128xf32>
    %c1 = arith.constant 1 : index
    %c0_9 = arith.constant 0 : index
    %12 = vector.load %arg6[%c1, %c0_9] : memref<4x128xf32, #tpu.memory_space<vmem>>, vector<1x128xf32>
    %13 = vector.broadcast %12 : vector<1x128xf32> to vector<16x128xf32>
    %14 = arith.addf %11, %13 : vector<16x128xf32>
    %cst_10 = arith.constant 0.000000e+00 : f32
    %15 = vector.broadcast %cst_10 : f32 to vector<16x128xf32>
    %16 = arith.maximumf %14, %15 : vector<16x128xf32>
    %17 = arith.truncf %16 : vector<16x128xf32> to vector<16x128xbf16>
    %c0_11 = arith.constant 0 : index
    %c0_12 = arith.constant 0 : index
    %18 = vector.load %arg4[%c0_11, %c0_12] : memref<128x128xbf16, #tpu.memory_space<vmem>>, vector<128x128xbf16>
    %cst_13 = arith.constant dense<0.000000e+00> : vector<16x128xf32>
    %19 = tpu.matmul %17, %18, %cst_13 {dimension_numbers = #tpu.dot_dimension_numbers<[1], [0], [0], [1], [0, 0, 1, 1], [], []>} : vector<16x128xbf16>, vector<128x128xbf16>, vector<16x128xf32> -> vector<16x128xf32>
    %c2 = arith.constant 2 : index
    %c0_14 = arith.constant 0 : index
    %20 = vector.load %arg6[%c2, %c0_14] : memref<4x128xf32, #tpu.memory_space<vmem>>, vector<1x128xf32>
    %21 = vector.broadcast %20 : vector<1x128xf32> to vector<16x128xf32>
    %22 = arith.addf %19, %21 : vector<16x128xf32>
    %cst_15 = arith.constant 0.000000e+00 : f32
    %23 = vector.broadcast %cst_15 : f32 to vector<16x128xf32>
    %24 = arith.maximumf %22, %23 : vector<16x128xf32>
    %25 = arith.truncf %24 : vector<16x128xf32> to vector<16x128xbf16>
    %c0_16 = arith.constant 0 : index
    %c0_17 = arith.constant 0 : index
    %26 = vector.load %arg5[%c0_16, %c0_17] : memref<128x128xbf16, #tpu.memory_space<vmem>>, vector<128x128xbf16>
    %cst_18 = arith.constant dense<0.000000e+00> : vector<16x128xf32>
    %27 = tpu.matmul %25, %26, %cst_18 {dimension_numbers = #tpu.dot_dimension_numbers<[1], [0], [0], [1], [0, 0, 1, 1], [], []>} : vector<16x128xbf16>, vector<128x128xbf16>, vector<16x128xf32> -> vector<16x128xf32>
    %c3 = arith.constant 3 : index
    %c0_19 = arith.constant 0 : index
    %28 = vector.load %arg6[%c3, %c0_19] : memref<4x128xf32, #tpu.memory_space<vmem>>, vector<1x128xf32>
    %29 = vector.broadcast %28 : vector<1x128xf32> to vector<16x128xf32>
    %30 = arith.addf %27, %29 : vector<16x128xf32>
    %c0_20 = arith.constant 0 : index
    %c0_21 = arith.constant 0 : index
    %31 = vector.load %arg7[%c0_20, %c0_21] : memref<16x128xf32, #tpu.memory_space<vmem>>, vector<16x128xf32>
    tpu.vector_store %arg7[%c0_20, %c0_21], %30 {strides = array<i32>} : memref<16x128xf32, #tpu.memory_space<vmem>>, vector<16x128xf32>,
    return
  }
  func.func @transform_0(%arg0: i32) -> (i32, i32) {
    %c0_i32 = arith.constant 0 : i32
    %c0_i32_0 = arith.constant 0 : i32
    return %arg0, %c0_i32 : i32, i32
  }
  func.func @transform_1(%arg0: i32) -> (i32, i32) {
    %c0_i32 = arith.constant 0 : i32
    %c0_i32_0 = arith.constant 0 : i32
    %c0_i32_1 = arith.constant 0 : i32
    return %c0_i32, %c0_i32_0 : i32, i32
  }
  func.func @transform_2(%arg0: i32) -> (i32, i32) {
    %c0_i32 = arith.constant 0 : i32
    %c0_i32_0 = arith.constant 0 : i32
    %c0_i32_1 = arith.constant 0 : i32
    return %c0_i32, %c0_i32_0 : i32, i32
  }
  func.func @transform_3(%arg0: i32) -> (i32, i32) {
    %c0_i32 = arith.constant 0 : i32
    %c0_i32_0 = arith.constant 0 : i32
    %c0_i32_1 = arith.constant 0 : i32
    return %c0_i32, %c0_i32_0 : i32, i32
  }
  func.func @transform_4(%arg0: i32) -> (i32, i32) {
    %c0_i32 = arith.constant 0 : i32
    %c0_i32_0 = arith.constant 0 : i32
    %c0_i32_1 = arith.constant 0 : i32
    return %c0_i32, %c0_i32_0 : i32, i32
  }
  func.func @transform_5(%arg0: i32) -> (i32, i32) {
    %c0_i32 = arith.constant 0 : i32
    %c0_i32_0 = arith.constant 0 : i32
    %c0_i32_1 = arith.constant 0 : i32
    return %c0_i32, %c0_i32_0 : i32, i32
  }
  func.func @transform_6(%arg0: i32) -> (i32, i32) {
    %c0_i32 = arith.constant 0 : i32
    %c0_i32_0 = arith.constant 0 : i32
    return %arg0, %c0_i32 : i32, i32
  }
}

</mosaic_0001>

<bundles_post_ra>
// kernel: tpu_custom_call.1
= control target key start
LH: loop header
LB: loop body
LE: loop exit
PB: predicated region body
PF: predicated region fallthrough
CT: control target
= control target key end

     0   :  { %11 = vsyncpa [#allocation3], 0  ;;  %s1746_s0 = inlined_call_operand.hbm [shape: f32[32,32], index: 0, kind: input, shape index: {}]   ;;  %s1747_s1 = inlined_call_operand.hbm [shape: bf16[32,128], index: 1, kind: input, shape index: {}]   ;;  %s1748_s2 = inlined_call_operand.hbm [shape: bf16[128,128], index: 2, kind: input, shape index: {}]   ;;  %s1749_s3 = inlined_call_operand.hbm [shape: bf16[128,128], index: 3, kind: input, shape index: {}]   ;;  %s1750_s4 = inlined_call_operand.hbm [shape: bf16[128,128], index: 4, kind: input, shape index: {}]   ;;  %s1751_s5 = inlined_call_operand.vmem [shape: f32[4,128], index: 5, kind: input, shape index: {}]   ;;  %s1752_s6 = inlined_call_operand.hbm [shape: f32[32,128], index: 6, kind: output, shape index: {}]  }
   0x1   :  { %13 = vsyncpa [#allocation3 + $0x1], 0 }
   0x2   :  { %14 = vsyncpa [#allocation6], 0 }
   0x3   :  { %15 = vsyncpa [#allocation9], 0 }
   0x4   :  { %16 = vsyncpa [#allocation4], 0 }
   0x5   :  { %18 = vsyncpa [#allocation4 + $0x1], 0  ;;  %s1407_s21 = smov 0   ;;  %s1409_s22 = smov 0  }
   0x6   :  { %s1411_s23 = smov 0   ;;  %s1413_s24 = smov 0  }
   0x7 LB: > { %s1428_s25 = sadd.s32 4294967295, %s1356_s24   ;;  %s866_s26 = sadd.s32 4294967294, %s1356_s24   ;;  %s1356_s24 = sphi %s1413_s24, %s1775_s24   ;;  %s1352_s23 = sphi %s1411_s23, %s1774_s23   ;;  %s1348_s22 = sphi %s1409_s22, %s1773_s22   ;;  %s1344_s21 = sphi %s1407_s21, %s1772_s21  }
   0x8   : > { %p44_p0 = scmp.ne.s32.totalorder %s1348_s22, %s1344_s21  ;;  %p1753_p1 = scmp.eq.s32.totalorder %s1428_s25, 0 }
   0x9   : > { %p179_p3 = scmp.eq.s32.totalorder %s866_s26, 1  ;;  %p867_p5 = scmp.ge.s32.totalorder %s1356_s24, 1 }
   0xa   : > { %p1437_p4 = por %p1753_p1, %p44_p0  ;;  %p186_p7 = scmp.lt.s32.totalorder %s1356_s24, 3 }
   0xb   : > { %p1442_p6 = por %p179_p3, %p44_p0  ;;  %s1358_s30 = smov [#allocation5]  }
   0xc   : > { %s1756_s27 = scalar_select %p1437_p4, 1, 0 }
   0xd   : > { %s1757_s28 = scalar_select %p1442_p6, 1, 0 }
   0xe   : > { %p1447_p8 = pnand %p867_p5, %p186_p7  ;;  %s198_s7 = sshll.u32 %s1358_s30, 4  ;;  %s1451_s7 = int_to_ptr.vmem [resolvable:$true] %s198_s7 }
   0xf   : > { %s1359_s9 = smov [#allocation8]   ;;  %s1360_s11 = smov [#allocation7]  }
  0x10   : > { %s1758_s29 = scalar_select %p1447_p8, 1, 0 }
  0x11   : > { %p1039_p9 = pneg %p1447_p8  ;;  %s224_s10 = sshll.u32 %s1359_s9, 4  ;;  %s1462_s10 = int_to_ptr.vmem [resolvable:$true] %s224_s10 }
  0x12   : > { %s1464_s12 = sshll.u32 %s1360_s11, 4  ;;  %s1140_s15 = scalar_lea.hbm %s1747_s1, 256  ;;  %s212_s12 = int_to_ptr.vmem [resolvable:$true] %s1464_s12 }
  0x13   : > { %p1458_p11 = pnand %p1039_p9, %p1753_p1  ;;  %p1141_p12 = scmp.ne.s32.totalorder %s1747_s1, %s1140_s15 }
  0x14   : > { %p1147_p5 = scmp.lt.u32.totalorder %s1140_s15, %s1747_s1 }
  0x15   : > { %p1474_p13 = pneg %p1458_p11 }
  0x17   : > { %p1143_p0 = pnand %p1474_p13, %p1141_p12 }
  0x19   : > { %p1144_p3 = pneg %p1143_p0 }
  0x1b   : > { %p1149_p7 = pnand %p1147_p5, %p1144_p3 }
  0x1d   : > { %1152 = shalt.err (!%p1149_p7)
}
  0x1e   : > { %s1153_s26 = scalar_lea.vmem %s1451_s7, 256  ;;  %p1161_p2 = scmp.lt.s32.totalorder %s1451_s7, %s1451_s7 }
  0x1f   : > { %p1154_p9 = scmp.ne.s32.totalorder %s1451_s7, %s1153_s26  ;;  %p1162_p6 = scmp.lt.s32.totalorder %s1153_s26, %s1153_s26 }
  0x21   : > { %p1156_p10 = pnand %p1154_p9, %p1474_p13  ;;  %p1163_p12 = por %p1162_p6, %p1161_p2 }
  0x23   : > { %p1157_p1 = pneg %p1156_p10 }
  0x25   : > { %p1164_p0 = pnand %p1163_p12, %p1157_p1 }
  0x27   : > { %1167 = shalt.err (!%p1164_p0)
}
  0x28   : > { %s1361_s30 = smov 64   ;;  %s1362_s9 = smov 4  }
  0x29   : > { %1042 = dma.hbm_to_vmem [thread:$0]  (!%p1458_p11), %s1747_s1, 256, %s1451_s7, [#allocation6], %s1361_s30, %s1361_s30, %s1362_s9  }
  0x2a   : > { %s1168_s16 = scalar_lea.hbm %s1749_s3, 1024 }
  0x2b   : > { %p1169_p1 = scmp.ne.s32.totalorder %s1749_s3, %s1168_s16  ;;  %p1175_p10 = scmp.lt.u32.totalorder %s1168_s16, %s1749_s3 }
  0x2d   : > { %p1171_p2 = pnand %p1169_p1, %p1474_p13 }
  0x2f   : > { %p1172_p6 = pneg %p1171_p2 }
  0x31   : > { %p1177_p3 = pnand %p1175_p10, %p1172_p6 }
  0x33   : > { %1180 = shalt.err (!%p1177_p3)
}
  0x34   : > { %s1181_s7 = scalar_lea.vmem %s1462_s10, 1024  ;;  %p1189_p12 = scmp.lt.s32.totalorder %s1462_s10, %s1462_s10 }
  0x35   : > { %p1182_p5 = scmp.ne.s32.totalorder %s1462_s10, %s1181_s7  ;;  %p1190_p0 = scmp.lt.s32.totalorder %s1181_s7, %s1181_s7 }
  0x37   : > { %p1184_p7 = pnand %p1182_p5, %p1474_p13  ;;  %p1191_p1 = por %p1190_p0, %p1189_p12 }
  0x39   : > { %p1185_p9 = pneg %p1184_p7 }
  0x3b   : > { %p1192_p2 = pnand %p1191_p1, %p1185_p9 }
  0x3d   : > { %1195 = shalt.err (!%p1192_p2)
}
  0x3e   : > { %1048 = dma.hbm_to_vmem [thread:$0]  (!%p1458_p11), %s1749_s3, 1024, %s1462_s10, [#allocation9], %s1361_s30, %s1361_s30, %s1362_s9  }
  0x3f   : > { %s1196_s16 = scalar_lea.hbm %s1748_s2, 1024 }
  0x40   : > { %p1197_p6 = scmp.ne.s32.totalorder %s1748_s2, %s1196_s16  ;;  %p1203_p5 = scmp.lt.u32.totalorder %s1196_s16, %s1748_s2 }
  0x42   : > { %p1199_p10 = pnand %p1197_p6, %p1474_p13 }
  0x44   : > { %p1200_p3 = pneg %p1199_p10 }
  0x46   : > { %p1205_p7 = pnand %p1203_p5, %p1200_p3 }
  0x48   : > { %1208 = shalt.err (!%p1205_p7)
}
  0x49   : > { %s1209_s7 = scalar_lea.vmem %s212_s12, 1024  ;;  %p1217_p1 = scmp.lt.s32.totalorder %s212_s12, %s212_s12 }
  0x4a   : > { %p1210_p9 = scmp.ne.s32.totalorder %s212_s12, %s1209_s7  ;;  %p1218_p2 = scmp.lt.s32.totalorder %s1209_s7, %s1209_s7 }
  0x4c   : > { %p1212_p12 = pnand %p1210_p9, %p1474_p13  ;;  %p1219_p4 = por %p1218_p2, %p1217_p1 }
  0x4e   : > { %p1213_p0 = pneg %p1212_p12 }
  0x50   : > { %p1220_p8 = pnand %p1219_p4, %p1213_p0 }
  0x52   : > { %1223 = shalt.err (!%p1220_p8)
}
  0x53   : > { %1045 = dma.hbm_to_vmem [thread:$0]  (!%p1458_p11), %s1748_s2, 1024, %s212_s12, [#allocation6], %s1361_s30, %s1361_s30, %s1362_s9  }
  0x54   : > { %s1363_s13 = smov [#allocation10]   ;;  %s1224_s17 = scalar_lea.hbm %s1750_s4, 1024 }
  0x55   : > { %s237_s14 = sshll.u32 %s1363_s13, 4  ;;  %p1225_p4 = scmp.ne.s32.totalorder %s1750_s4, %s1224_s17  ;;  %s238_s14 = int_to_ptr.vmem [resolvable:$true] %s237_s14 }
  0x56   : > { %p1231_p10 = scmp.lt.u32.totalorder %s1224_s17, %s1750_s4 }
  0x57   : > { %p1227_p8 = pnand %p1225_p4, %p1474_p13 }
  0x59   : > { %p1228_p6 = pneg %p1227_p8 }
  0x5b   : > { %p1233_p3 = pnand %p1231_p10, %p1228_p6 }
  0x5d   : > { %1236 = shalt.err (!%p1233_p3)
}
  0x5e   : > { %s1237_s12 = scalar_lea.vmem %s238_s14, 1024  ;;  %p1245_p12 = scmp.lt.s32.totalorder %s238_s14, %s238_s14 }
  0x5f   : > { %p1238_p5 = scmp.ne.s32.totalorder %s238_s14, %s1237_s12  ;;  %p1246_p0 = scmp.lt.s32.totalorder %s1237_s12, %s1237_s12 }
  0x61   : > { %p1240_p7 = pnand %p1238_p5, %p1474_p13  ;;  %p1247_p1 = por %p1246_p0, %p1245_p12 }
  0x63   : > { %p1241_p9 = pneg %p1240_p7 }
  0x65   : > { %p1248_p2 = pnand %p1247_p1, %p1241_p9 }
  0x67   : > { %1251 = shalt.err (!%p1248_p2)
}
  0x68   : > { %1051 = dma.hbm_to_vmem [thread:$0]  (!%p1458_p11), %s1750_s4, 1024, %s238_s14, [#allocation9], %s1361_s30, %s1361_s30, %s1362_s9  }
  0x69   : > { %s1568_s18 = sadd.s32 1, %s1356_s24   ;;  %s31_s8 = sadd.s32 1, %s1352_s23 }
  0x6a   : > { %s28_s13 = ssub.s32 %s1356_s24, %s1568_s18  ;;  %p38_p13 = scmp.ne.s32.totalorder %s1352_s23, %s1348_s22 }
  0x6b   : > { %p29_p4 = scmp.eq.s32.totalorder %s28_s13, 0  ;;  %p39_p8 = scmp.eq.s32.totalorder %s1356_s24, 0 }
  0x6c   : > { %p1761_p6 = scmp.eq.s32.totalorder %s1428_s25, 1  ;;  %p1064_p3 = scmp.lt.s32.totalorder %s1356_s24, 2 }
  0x6d   : > { %s1584_s16 = scalar_select %p29_p4, %s1352_s23, %s31_s8  }
  0x6e   : > { %p1578_p10 = por %p1761_p6, %p38_p13  ;;  %p40_p5 = por %p39_p8, %p38_p13 }
  0x6f   : > { %s254_s17 = sand.u32 1, %s1352_s23   ;;  %s919_s30 = sshll.u32 %s1356_s24, 8 }
  0x70   : > { %s873_s19 = sshll.u32 %s254_s17, 4  ;;  %s1591_s20 = scalar_lea.hbm %s1746_s0, %s919_s30 }
  0x71   : > { %s258_s26 = scalar_lea.vmem [#allocation2], %s873_s19  ;;  %p1595_p11 = pnand %p1064_p3, %p40_p5 }
  0x72   : > { %s265_s7 = sshll.u32 %s258_s26, 4  ;;  %s1599_s10 = scalar_lea.sflag [#allocation3], %s254_s17  ;;  %s1593_s7 = int_to_ptr.vmem [resolvable:$true] %s265_s7 }
  0x73   : > { %s1252_s11 = scalar_lea.hbm %s1591_s20, 256  ;;  %p1254_p9 = pneg %p1595_p11 }
  0x74   : > { %p1253_p7 = scmp.ne.s32.totalorder %s1591_s20, %s1252_s11  ;;  %s1257_s19 = scalar_lea.hbm %s1746_s0, 512 }
  0x75   : > { %p1258_p1 = scmp.lt.u32.totalorder %s1591_s20, %s1746_s0  ;;  %p1259_p2 = scmp.lt.u32.totalorder %s1257_s19, %s1252_s11 }
  0x76   : > { %p1255_p12 = pnand %p1254_p9, %p1253_p7  ;;  %p1261_p4 = scmp.lt.u32.totalorder %s1252_s11, %s1591_s20 }
  0x77   : > { %p1260_p13 = por %p1259_p2, %p1258_p1 }
  0x78   : > { %p1256_p0 = pneg %p1255_p12 }
  0x79   : > { %p1262_p8 = por %p1261_p4, %p1260_p13 }
  0x7b   : > { %p1263_p6 = pnand %p1262_p8, %p1256_p0 }
  0x7d   : > { %1266 = shalt.err (!%p1263_p6)
}
  0x7e   : > { %s1267_s17 = scalar_lea.vmem %s1593_s7, 256  ;;  %s1364_s14 = smov [#allocation2]  }
  0x7f   : > { %p1268_p3 = scmp.ne.s32.totalorder %s1593_s7, %s1267_s17  ;;  %s1272_s26 = sshll.u32 %s1364_s14, 4  ;;  %s1273_s26 = int_to_ptr.vmem [resolvable:$false] %s1272_s26 }
  0x80   : > { %s1274_s8 = scalar_lea.vmem %s1273_s26, 512  ;;  %p1275_p12 = scmp.lt.s32.totalorder %s1593_s7, %s1273_s26 }
  0x81   : > { %p1270_p5 = pnand %p1268_p3, %p1254_p9  ;;  %p1276_p1 = scmp.lt.s32.totalorder %s1274_s8, %s1267_s17 }
  0x83   : > { %p1271_p7 = pneg %p1270_p5  ;;  %p1277_p2 = por %p1276_p1, %p1275_p12 }
  0x85   : > { %p1278_p13 = pnand %p1277_p2, %p1271_p7 }
  0x87   : > { %1281 = shalt.err (!%p1278_p13)
}
  0x88   : > { %s1365_s11 = smov 128   ;;  %s1366_s13 = smov 8  }
  0x89   : > { %1055 = dma.hbm_to_vmem [thread:$0]  (!%p1595_p11), %s1591_s20, 256, %s1593_s7, %s1599_s10, %s1365_s11, %s1365_s11, %s1366_s13  }
  0x8a   : > { %p1764_p9 = scmp.ne.s32.totalorder %s1758_s29, 0 }
  0x8b   : > { %s1630_s19 = sand.u32 (!%p1764_p9), 1, %s1348_s22   ;;  %p1765_p0 = scmp.ne.s32.totalorder (!%p1764_p9), %s1756_s27, 0 }
  0x8c   : > { %277 = sbr.rel (%p1764_p9) target bundleno = 1056 (0x420), region = 44  ;;  %s877_s30 = sshll.u32 (!%p1764_p9), %s1630_s19, 4 }
  0x8d   : > { %s280_s9 = scalar_lea.sflag (!%p1764_p9), [#allocation3], %s1630_s19  ;;  %s283_s17 = scalar_lea.vmem (!%p1764_p9), [#allocation2], %s877_s30 }
  0x93   : > { %1327 = dma.done.wait (%p1765_p0), %s280_s9, 256  }
  0x94   : > { %1329 = vsyncadd (%p1765_p0), %s280_s9, 4294967040  ;;  %p1766_p11 = scmp.eq.s32.totalorder %s1428_s25, 0 }
  0x96   : > { %1331 = dma.done.wait (%p1766_p11), [#allocation6], 1280   ;;  %p1767_p4 = pmov %p1766_p11 }
  0x98   : > { %1333 = vsyncadd (%p1767_p4), [#allocation6], 4294966016  ;;  %p1768_p8 = pmov %p1767_p4 }
  0x99   : > { %p1769_p6 = pmov %p1767_p4 }
  0x9a   : > { %1335 = dma.done.wait (%p1768_p8), [#allocation9], 2048  }
  0x9b   : > { %1337 = vsyncadd (%p1769_p6), [#allocation9], 4294965248  ;;  %v1367_v0 = vmov 0.0   ;;  %vm1368_vm0 = vmmov 0   ;;  %v1114_v1 = vld [vmem:[#allocation5] sm:$0xff]   ;;  %v1115_v2 = vld [vmem:[#allocation5 + $0x8] sm:$0xff]  }
  0x9c   : > { %951 = vmatprep.subr.bf16.mxu0 %v1367_v0  ;;  %955 = vmatprep.mubr.msk.bf16.mxu0 %vm1368_vm0, %v1367_v0  ;;  %v331_v3 = vld [vmem:[%s283_s17] sm:$0xff]  ;;  %v332_v4 = vld [vmem:[%s283_s17 + $0x8] sm:$0xff]  ;;  %vm355_vm1 = vcmask 261120   ;;  %s327_s8 = scalar_lea.vmem [#allocation11], %s877_s30  ;;  %s920_s13 = sshll.u32 %s1428_s25, 8 }
  0x9d   : > { %959 = vmatprep.subr.bf16.mxu1 %v1367_v0  ;;  %975 = vmatprep.mubr.msk.bf16.mxu1 %vm1368_vm0, %v1367_v0  ;;  %v1116_v5 = vld [vmem:[#allocation7] sm:$0xff]   ;;  %v333_v6 = vpack.c.bf16 %v332_v4, %v331_v3  ;;  %v1117_v7 = vld [vmem:[#allocation7 + $0x8] sm:$0xff]   ;;  %v1118_v8 = vld [vmem:[#allocation7 + $0x10] sm:$0xff]   ;;  %s755_s11 = sshll.u32 %s327_s8, 4  ;;  %s1702_s27 = scalar_lea.hbm %s1752_s6, %s920_s13  ;;  %s1697_s11 = int_to_ptr.vmem [resolvable:$true] %s755_s11 }
  0x9e   : > { %952 = vmatpush3.bf16.msra.mxu0 %v1114_v1  ;;  %960 = vmatpush3.bf16.msra.mxu1 %v1116_v5  ;;  %v1119_v9 = vld [vmem:[#allocation7 + $0x18] sm:$0xff]   ;;  %v1120_v10 = vld [vmem:[#allocation7 + $0x20] sm:$0xff]   ;;  %v1121_v11 = vld [vmem:[#allocation7 + $0x28] sm:$0xff]   ;;  %s742_s30 = scalar_lea.sflag [#allocation4], %s1630_s19  ;;  %s1282_s25 = scalar_lea.vmem %s1697_s11, 256 }
  0x9f   : > { %953 = vmatprep.subr.bf16.mxu0 %v1367_v0  ;;  %961 = vmatprep.subr.bf16.mxu1 %v1367_v0  ;;  %v1122_v12 = vld [vmem:[#allocation7 + $0x30] sm:$0xff]   ;;  %v1123_v13 = vld [vmem:[#allocation7 + $0x38] sm:$0xff]   ;;  %v1124_v14 = vld [vmem:[#allocation8] sm:$0xff]   ;;  %p1283_p3 = scmp.ne.s32.totalorder %s1697_s11, %s1282_s25  ;;  %s1369_s29 = smov [#allocation11]  }
  0xa0   : > { %v1125_v15 = vld [vmem:[#allocation8 + $0x8] sm:$0xff]   ;;  %v1126_v16 = vld [vmem:[#allocation8 + $0x10] sm:$0xff]   ;;  %v1127_v17 = vld [vmem:[#allocation8 + $0x18] sm:$0xff]   ;;  %s1286_s20 = sshll.u32 %s1369_s29, 4  ;;  %s1287_s20 = int_to_ptr.vmem [resolvable:$false] %s1286_s20 }
  0xa1   : > { %v1128_v18 = vld [vmem:[#allocation8 + $0x20] sm:$0xff]   ;;  %v1129_v19 = vld [vmem:[#allocation8 + $0x28] sm:$0xff]   ;;  %v883_v20 = vld [vmem:[%s1751_s5] ss:$0 sm:$0xff]  ;;  %p1284_p5 = pnand %p1283_p3, %p1578_p10  ;;  %s1288_s7 = scalar_lea.vmem %s1287_s20, 512 }
  0xa2   : > { %954 = vmatpush3.bf16.msra.mxu0 %v1115_v2  ;;  %962 = vmatpush3.bf16.msra.mxu1 %v1117_v7  ;;  %v1130_v30 = vld [vmem:[#allocation8 + $0x30] sm:$0xff]   ;;  %v1131_v31 = vld [vmem:[#allocation8 + $0x38] sm:$0xff]   ;;  %v1132_v32 = vld [vmem:[#allocation10] sm:$0xff]   ;;  %p1289_p12 = scmp.lt.s32.totalorder %s1697_s11, %s1287_s20  ;;  %p1290_p1 = scmp.lt.s32.totalorder %s1288_s7, %s1282_s25 }
  0xa3   : > { %979 = vmatprep.subr.bf16.mxu0 %v1367_v0  ;;  %963 = vmatprep.subr.bf16.mxu1 %v1367_v0  ;;  %v1133_v33 = vld [vmem:[#allocation10 + $0x8] sm:$0xff]   ;;  %v1134_v34 = vld [vmem:[#allocation10 + $0x10] sm:$0xff]   ;;  %v1135_v35 = vld [vmem:[#allocation10 + $0x18] sm:$0xff]   ;;  %p1285_p7 = pneg %p1284_p5 }
  0xa4   : > { %v1136_v36 = vld [vmem:[#allocation10 + $0x20] sm:$0xff]   ;;  %v1137_v37 = vld [vmem:[#allocation10 + $0x28] sm:$0xff]   ;;  %v887_v38 = vld [vmem:[%s1751_s5 + $0x1] ss:$0 sm:$0xff]  ;;  %p1291_p2 = por %p1290_p1, %p1289_p12 }
  0xa5   : > { %956 = vmatmul.mubr.msk.bf16.vlgmr.msra.gmra.mrb[0].mxu0 %vm355_vm1, %v333_v6  ;;  %v1138_v48 = vld [vmem:[#allocation10 + $0x30] sm:$0xff]   ;;  %v1139_v49 = vld [vmem:[#allocation10 + $0x38] sm:$0xff]  }
  0xa6   : > { %995 = vmatprep.mubr.msk.bf16.mxu0 %vm1368_vm0, %v1367_v0  ;;  %964 = vmatpush3.bf16.msra.mxu1 %v1118_v8  ;;  %v896_v50 = vld [vmem:[%s1751_s5 + $0x2] ss:$0 sm:$0xff]  ;;  %v905_v60 = vld [vmem:[%s1751_s5 + $0x3] ss:$0 sm:$0xff]  ;;  %p1292_p13 = pnand %p1291_p2, %p1285_p7 }
  0xa7   : > { %965 = vmatprep.subr.bf16.mxu1 %v1367_v0  ;;  %980 = vmatpush3.bf16.msra.mxu0 %v1124_v14 }
  0xa8   : > { %981 = vmatprep.subr.bf16.mxu0 %v1367_v0 }
  0xaa   : > { %966 = vmatpush3.bf16.msra.mxu1 %v1119_v9 }
  0xab   : > { %967 = vmatprep.subr.bf16.mxu1 %v1367_v0  ;;  %982 = vmatpush3.bf16.msra.mxu0 %v1125_v15 }
  0xac   : > { %983 = vmatprep.subr.bf16.mxu0 %v1367_v0 }
  0xae   : > { %968 = vmatpush3.bf16.msra.mxu1 %v1120_v10 }
  0xaf   : > { %969 = vmatprep.subr.bf16.mxu1 %v1367_v0  ;;  %984 = vmatpush3.bf16.msra.mxu0 %v1126_v16 }
  0xb0   : > { %985 = vmatprep.subr.bf16.mxu0 %v1367_v0 }
  0xb2   : > { %970 = vmatpush3.bf16.msra.mxu1 %v1121_v11 }
  0xb3   : > { %971 = vmatprep.subr.bf16.mxu1 %v1367_v0  ;;  %986 = vmatpush3.bf16.msra.mxu0 %v1127_v17 }
  0xb4   : > { %987 = vmatprep.subr.bf16.mxu0 %v1367_v0 }
  0xb6   : > { %972 = vmatpush3.bf16.msra.mxu1 %v1122_v12 }
  0xb7   : > { %973 = vmatprep.subr.bf16.mxu1 %v1367_v0  ;;  %988 = vmatpush3.bf16.msra.mxu0 %v1128_v18 }
  0xb8   : > { %989 = vmatprep.subr.bf16.mxu0 %v1367_v0 }
  0xba   : > { %974 = vmatpush3.bf16.msra.mxu1 %v1123_v13 }
  0xbb   : > { %999 = vmatprep.subr.bf16.mxu1 %v1367_v0  ;;  %990 = vmatpush3.bf16.msra.mxu0 %v1129_v19 }
  0xbc   : > { %991 = vmatprep.subr.bf16.mxu0 %v1367_v0 }
  0xbf   : > { %992 = vmatpush3.bf16.msra.mxu0 %v1130_v30 }
  0xc0   : > { %993 = vmatprep.subr.bf16.mxu0 %v1367_v0 }
  0xc3   : > { %994 = vmatpush3.bf16.msra.mxu0 %v1131_v31 }
 0x178   : > { %v393_v21 = vpop.f32.mrb[0].mxu0 }
 0x179   : > { %v394_v22 = vadd.f32 %v883_v20, %v393_v21  ;;  %v957_v23 = vpop.f32.mrb[1].mxu0 }
 0x17a   : > { %v396_v24 = vpop.f32.mrb[2].mxu0 }
 0x17b   : > { %v397_v25 = vadd.f32 %v883_v20, %v396_v24  ;;  %v958_v26 = vpop.f32.mrb[3].mxu0  ;;  %v400_v27 = vmax.f32 %v394_v22, 0.0 }
 0x17d   : > { %v401_v28 = vmax.f32 %v397_v25, 0.0 }
 0x17f   : > { %v402_v29 = vpack.c.bf16 %v401_v28, %v400_v27 }
 0x181   : > { %976 = vmatmul.mubr.bf16.vlgmr.msra.gmra.mrb[0].mxu1 %v402_v29 }
 0x182   : > { %1015 = vmatprep.mubr.msk.bf16.mxu1 %vm1368_vm0, %v1367_v0  ;;  %1000 = vmatpush3.bf16.msra.mxu1 %v1132_v32 }
 0x183   : > { %1001 = vmatprep.subr.bf16.mxu1 %v1367_v0 }
 0x186   : > { %1002 = vmatpush3.bf16.msra.mxu1 %v1133_v33 }
 0x187   : > { %1003 = vmatprep.subr.bf16.mxu1 %v1367_v0 }
 0x18a   : > { %1004 = vmatpush3.bf16.msra.mxu1 %v1134_v34 }
 0x18b   : > { %1005 = vmatprep.subr.bf16.mxu1 %v1367_v0 }
 0x18e   : > { %1006 = vmatpush3.bf16.msra.mxu1 %v1135_v35 }
 0x18f   : > { %1007 = vmatprep.subr.bf16.mxu1 %v1367_v0 }
 0x192   : > { %1008 = vmatpush3.bf16.msra.mxu1 %v1136_v36 }
 0x193   : > { %1009 = vmatprep.subr.bf16.mxu1 %v1367_v0 }
 0x196   : > { %1010 = vmatpush3.bf16.msra.mxu1 %v1137_v37 }
 0x197   : > { %1011 = vmatprep.subr.bf16.mxu1 %v1367_v0 }
 0x19a   : > { %1012 = vmatpush3.bf16.msra.mxu1 %v1138_v48 }
 0x19b   : > { %1013 = vmatprep.subr.bf16.mxu1 %v1367_v0 }
 0x19e   : > { %1014 = vmatpush3.bf16.msra.mxu1 %v1139_v49 }
 0x254   : > { %v506_v39 = vpop.f32.mrb[0].mxu1 }
 0x255   : > { %v507_v40 = vadd.f32 %v887_v38, %v506_v39  ;;  %v977_v41 = vpop.f32.mrb[1].mxu1 }
 0x256   : > { %v509_v42 = vpop.f32.mrb[2].mxu1 }
 0x257   : > { %v510_v43 = vadd.f32 %v887_v38, %v509_v42  ;;  %v978_v44 = vpop.f32.mrb[3].mxu1  ;;  %v513_v45 = vmax.f32 %v507_v40, 0.0 }
 0x259   : > { %v514_v46 = vmax.f32 %v510_v43, 0.0 }
 0x25b   : > { %v515_v47 = vpack.c.bf16 %v514_v46, %v513_v45 }
 0x25d   : > { %996 = vmatmul.mubr.bf16.vlgmr.msra.gmra.mrb[4].mxu0 %v515_v47 }
 0x330   : > { %v619_v51 = vpop.f32.mrb[4].mxu0 }
 0x331   : > { %v620_v52 = vadd.f32 %v896_v50, %v619_v51  ;;  %v997_v53 = vpop.f32.mrb[5].mxu0 }
 0x332   : > { %v622_v54 = vpop.f32.mrb[6].mxu0 }
 0x333   : > { %v623_v55 = vadd.f32 %v896_v50, %v622_v54  ;;  %v998_v56 = vpop.f32.mrb[7].mxu0  ;;  %v626_v57 = vmax.f32 %v620_v52, 0.0 }
 0x335   : > { %v627_v58 = vmax.f32 %v623_v55, 0.0 }
 0x337   : > { %v628_v59 = vpack.c.bf16 %v627_v58, %v626_v57 }
 0x339   : > { %1016 = vmatmul.mubr.bf16.vlgmr.msra.gmra.mrb[4].mxu1 %v628_v59 }
 0x40c   : > { %v732_v61 = vpop.f32.mrb[4].mxu1 }
 0x40d   : > { %v733_v62 = vadd.f32 %v905_v60, %v732_v61  ;;  %v1017_v63 = vpop.f32.mrb[5].mxu1 }
 0x40e   : > { %v735_v0 = vpop.f32.mrb[6].mxu1 }
 0x40f   : > { %739 = vst [vmem:[%s327_s8] sm:$0xff] %v733_v62  ;;  %v736_v1 = vadd.f32 %v905_v60, %v735_v0  ;;  %v1018_v2 = vpop.f32.mrb[7].mxu1 }
 0x411   : > { %740 = vst [vmem:[%s327_s8 + $0x8] sm:$0xff] %v736_v1 }
 0x412   : > { %1295 = shalt.err (!%p1292_p13)
}
 0x413   : > { %s1296_s12 = scalar_lea.hbm %s1702_s27, 256  ;;  %s1300_s26 = scalar_lea.hbm %s1752_s6, 512 }
 0x414   : > { %p1297_p9 = scmp.ne.s32.totalorder %s1702_s27, %s1296_s12  ;;  %p1301_p4 = scmp.lt.u32.totalorder %s1702_s27, %s1752_s6 }
 0x415   : > { %p1302_p8 = scmp.lt.u32.totalorder %s1300_s26, %s1296_s12  ;;  %p1304_p3 = scmp.lt.u32.totalorder %s1296_s12, %s1702_s27 }
 0x416   : > { %p1298_p0 = pnand %p1297_p9, %p1578_p10 }
 0x417   : > { %p1303_p6 = por %p1302_p8, %p1301_p4 }
 0x418   : > { %p1299_p11 = pneg %p1298_p0 }
 0x419   : > { %p1305_p5 = por %p1304_p3, %p1303_p6 }
 0x41b   : > { %p1306_p7 = pnand %p1305_p5, %p1299_p11 }
 0x41d   : > { %1309 = shalt.err (!%p1306_p7)
}
 0x41e   : > { %s1370_s9 = smov 128   ;;  %s1371_s17 = smov 8  }
 0x41f   : > { %1037 = dma.vmem_to_hbm [thread:$0]  (%p1578_p10), %s1697_s11, 256, %s1702_s27, %s742_s30, %s1370_s9, %s1370_s9, %s1371_s17  }
 0x420 PF: > { %s770_s25 = sand.u32 1, %s1344_s21   ;;  %p1770_p12 = scmp.ne.s32.totalorder %s1757_s28, 0 }
 0x421   : > { %p1771_p1 = scmp.ge.s32.totalorder %s1356_s24, 2  ;;  %s771_s29 = scalar_lea.sflag [#allocation4], %s770_s25 }
 0x423   : > { %p1057_p2 = pnand %p1771_p1, %p1770_p12 }
 0x425   : > { %1339 = dma.done.wait (!%p1057_p2), %s771_s29, 256  }
 0x426   : > { %1341 = vsyncadd (!%p1057_p2), %s771_s29, 4294967040  ;;  %p21_p13 = scmp.ge.s32.totalorder %s1568_s18, 4   ;;  %s1772_s21 = smov %s1348_s22 }
 0x427   : > { %s1773_s22 = smov %s1352_s23  ;;  %s1774_s23 = smov %s1584_s16 }
 0x428   : > { %s1775_s24 = smov %s1568_s18  ;;  %23 = sbr.rel (!%p21_p13) target bundleno = 7 (0x7), region = 105 }
 0x42f   :  { %776 = vsyncpa [#allocation3], 1 }
 0x430   :  { %778 = vsyncpa [#allocation3 + $0x1], 1 }
 0x431   :  { %779 = vsyncpa [#allocation6], 1 }
 0x432   :  { %780 = vsyncpa [#allocation9], 1 }
 0x433   :  { %781 = vsyncpa [#allocation4], 1 }
 0x434   :  { %783 = vsyncpa [#allocation4 + $0x1], 1 }

// kernel: tpu_custom_call.1
= control target key start
LH: loop header
LB: loop body
LE: loop exit
PB: predicated region body
PF: predicated region fallthrough
CT: control target
= control target key end

     0   :  { %11 = vsyncpa [#allocation3], 0  ;;  %s1746_s0 = inlined_call_operand.hbm [shape: f32[32,32], index: 0, kind: input, shape index: {}]   ;;  %s1747_s1 = inlined_call_operand.hbm [shape: bf16[32,128], index: 1, kind: input, shape index: {}]   ;;  %s1748_s2 = inlined_call_operand.hbm [shape: bf16[128,128], index: 2, kind: input, shape index: {}]   ;;  %s1749_s3 = inlined_call_operand.hbm [shape: bf16[128,128], index: 3, kind: input, shape index: {}]   ;;  %s1750_s4 = inlined_call_operand.hbm [shape: bf16[128,128], index: 4, kind: input, shape index: {}]   ;;  %s1751_s5 = inlined_call_operand.vmem [shape: f32[4,128], index: 5, kind: input, shape index: {}]   ;;  %s1752_s6 = inlined_call_operand.hbm [shape: f32[32,128], index: 6, kind: output, shape index: {}]  }
   0x1   :  { %13 = vsyncpa [#allocation3 + $0x1], 0 }
   0x2   :  { %14 = vsyncpa [#allocation6], 0 }
   0x3   :  { %15 = vsyncpa [#allocation9], 0 }
   0x4   :  { %16 = vsyncpa [#allocation4], 0 }
   0x5   :  { %18 = vsyncpa [#allocation4 + $0x1], 0  ;;  %s1407_s21 = smov 0   ;;  %s1409_s22 = smov 0  }
   0x6   :  { %s1411_s23 = smov 0   ;;  %s1413_s24 = smov 0  }
   0x7 LB: > { %s1428_s25 = sadd.s32 4294967295, %s1356_s24   ;;  %s866_s26 = sadd.s32 4294967294, %s1356_s24   ;;  %s1356_s24 = sphi %s1413_s24, %s1775_s24   ;;  %s1352_s23 = sphi %s1411_s23, %s1774_s23   ;;  %s1348_s22 = sphi %s1409_s22, %s1773_s22   ;;  %s1344_s21 = sphi %s1407_s21, %s1772_s21  }
   0x8   : > { %p44_p0 = scmp.ne.s32.totalorder %s1348_s22, %s1344_s21  ;;  %p1753_p1 = scmp.eq.s32.totalorder %s1428_s25, 0 }
   0x9   : > { %p179_p3 = scmp.eq.s32.totalorder %s866_s26, 1  ;;  %p867_p5 = scmp.ge.s32.totalorder %s1356_s24, 1 }
   0xa   : > { %p1437_p4 = por %p1753_p1, %p44_p0  ;;  %p186_p7 = scmp.lt.s32.totalorder %s1356_s24, 3 }
   0xb   : > { %p1442_p6 = por %p179_p3, %p44_p0  ;;  %s1358_s30 = smov [#allocation5]  }
   0xc   : > { %s1756_s27 = scalar_select %p1437_p4, 1, 0 }
   0xd   : > { %s1757_s28 = scalar_select %p1442_p6, 1, 0 }
   0xe   : > { %p1447_p8 = pnand %p867_p5, %p186_p7  ;;  %s198_s7 = sshll.u32 %s1358_s30, 4  ;;  %s1451_s7 = int_to_ptr.vmem [resolvable:$true] %s198_s7 }
   0xf   : > { %s1359_s9 = smov [#allocation8]   ;;  %s1360_s11 = smov [#allocation7]  }
  0x10   : > { %s1758_s29 = scalar_select %p1447_p8, 1, 0 }
  0x11   : > { %p1039_p9 = pneg %p1447_p8  ;;  %s224_s10 = sshll.u32 %s1359_s9, 4  ;;  %s1462_s10 = int_to_ptr.vmem [resolvable:$true] %s224_s10 }
  0x12   : > { %s1464_s12 = sshll.u32 %s1360_s11, 4  ;;  %s1140_s15 = scalar_lea.hbm %s1747_s1, 256  ;;  %s212_s12 = int_to_ptr.vmem [resolvable:$true] %s1464_s12 }
  0x13   : > { %p1458_p11 = pnand %p1039_p9, %p1753_p1  ;;  %p1141_p12 = scmp.ne.s32.totalorder %s1747_s1, %s1140_s15 }
  0x14   : > { %p1147_p5 = scmp.lt.u32.totalorder %s1140_s15, %s1747_s1 }
  0x15   : > { %p1474_p13 = pneg %p1458_p11 }
  0x17   : > { %p1143_p0 = pnand %p1474_p13, %p1141_p12 }
  0x19   : > { %p1144_p3 = pneg %p1143_p0 }
  0x1b   : > { %p1149_p7 = pnand %p1147_p5, %p1144_p3 }
  0x1d   : > { %1152 = shalt.err (!%p1149_p7)
}
  0x1e   : > { %s1153_s26 = scalar_lea.vmem %s1451_s7, 256  ;;  %p1161_p2 = scmp.lt.s32.totalorder %s1451_s7, %s1451_s7 }
  0x1f   : > { %p1154_p9 = scmp.ne.s32.totalorder %s1451_s7, %s1153_s26  ;;  %p1162_p6 = scmp.lt.s32.totalorder %s1153_s26, %s1153_s26 }
  0x21   : > { %p1156_p10 = pnand %p1154_p9, %p1474_p13  ;;  %p1163_p12 = por %p1162_p6, %p1161_p2 }
  0x23   : > { %p1157_p1 = pneg %p1156_p10 }
  0x25   : > { %p1164_p0 = pnand %p1163_p12, %p1157_p1 }
  0x27   : > { %1167 = shalt.err (!%p1164_p0)
}
  0x28   : > { %s1361_s30 = smov 64   ;;  %s1362_s9 = smov 4  }
  0x29   : > { %1042 = dma.hbm_to_vmem [thread:$0]  (!%p1458_p11), %s1747_s1, 256, %s1451_s7, [#allocation6], %s1361_s30, %s1361_s30, %s1362_s9  }
  0x2a   : > { %s1168_s16 = scalar_lea.hbm %s1749_s3, 1024 }
  0x2b   : > { %p1169_p1 = scmp.ne.s32.totalorder %s1749_s3, %s1168_s16  ;;  %p1175_p10 = scmp.lt.u32.totalorder %s1168_s16, %s1749_s3 }
  0x2d   : > { %p1171_p2 = pnand %p1169_p1, %p1474_p13 }
  0x2f   : > { %p1172_p6 = pneg %p1171_p2 }
  0x31   : > { %p1177_p3 = pnand %p1175_p10, %p1172_p6 }
  0x33   : > { %1180 = shalt.err (!%p1177_p3)
}
  0x34   : > { %s1181_s7 = scalar_lea.vmem %s1462_s10, 1024  ;;  %p1189_p12 = scmp.lt.s32.totalorder %s1462_s10, %s1462_s10 }
  0x35   : > { %p1182_p5 = scmp.ne.s32.totalorder %s1462_s10, %s1181_s7  ;;  %p1190_p0 = scmp.lt.s32.totalorder %s1181_s7, %s1181_s7 }
  0x37   : > { %p1184_p7 = pnand %p1182_p5, %p1474_p13  ;;  %p1191_p1 = por %p1190_p0, %p1189_p12 }
  0x39   : > { %p1185_p9 = pneg %p1184_p7 }
  0x3b   : > { %p1192_p2 = pnand %p1191_p1, %p1185_p9 }
  0x3d   : > { %1195 = shalt.err (!%p1192_p2)
}
  0x3e   : > { %1048 = dma.hbm_to_vmem [thread:$0]  (!%p1458_p11), %s1749_s3, 1024, %s1462_s10, [#allocation9], %s1361_s30, %s1361_s30, %s1362_s9  }
  0x3f   : > { %s1196_s16 = scalar_lea.hbm %s1748_s2, 1024 }
  0x40   : > { %p1197_p6 = scmp.ne.s32.totalorder %s1748_s2, %s1196_s16  ;;  %p1203_p5 = scmp.lt.u32.totalorder %s1196_s16, %s1748_s2 }
  0x42   : > { %p1199_p10 = pnand %p1197_p6, %p1474_p13 }
  0x44   : > { %p1200_p3 = pneg %p1199_p10 }
  0x46   : > { %p1205_p7 = pnand %p1203_p5, %p1200_p3 }
  0x48   : > { %1208 = shalt.err (!%p1205_p7)
}
  0x49   : > { %s1209_s7 = scalar_lea.vmem %s212_s12, 1024  ;;  %p1217_p1 = scmp.lt.s32.totalorder %s212_s12, %s212_s12 }
  0x4a   : > { %p1210_p9 = scmp.ne.s32.totalorder %s212_s12, %s1209_s7  ;;  %p1218_p2 = scmp.lt.s32.totalorder %s1209_s7, %s1209_s7 }
  0x4c   : > { %p1212_p12 = pnand %p1210_p9, %p1474_p13  ;;  %p1219_p4 = por %p1218_p2, %p1217_p1 }
  0x4e   : > { %p1213_p0 = pneg %p1212_p12 }
  0x50   : > { %p1220_p8 = pnand %p1219_p4, %p1213_p0 }
  0x52   : > { %1223 = shalt.err (!%p1220_p8)
}
  0x53   : > { %1045 = dma.hbm_to_vmem [thread:$0]  (!%p1458_p11), %s1748_s2, 1024, %s212_s12, [#allocation6], %s1361_s30, %s1361_s30, %s1362_s9  }
  0x54   : > { %s1363_s13 = smov [#allocation10]   ;;  %s1224_s17 = scalar_lea.hbm %s1750_s4, 1024 }
  0x55   : > { %s237_s14 = sshll.u32 %s1363_s13, 4  ;;  %p1225_p4 = scmp.ne.s32.totalorder %s1750_s4, %s1224_s17  ;;  %s238_s14 = int_to_ptr.vmem [resolvable:$true] %s237_s14 }
  0x56   : > { %p1231_p10 = scmp.lt.u32.totalorder %s1224_s17, %s1750_s4 }
  0x57   : > { %p1227_p8 = pnand %p1225_p4, %p1474_p13 }
  0x59   : > { %p1228_p6 = pneg %p1227_p8 }
  0x5b   : > { %p1233_p3 = pnand %p1231_p10, %p1228_p6 }
  0x5d   : > { %1236 = shalt.err (!%p1233_p3)
}
  0x5e   : > { %s1237_s12 = scalar_lea.vmem %s238_s14, 1024  ;;  %p1245_p12 = scmp.lt.s32.totalorder %s238_s14, %s238_s14 }
  0x5f   : > { %p1238_p5 = scmp.ne.s32.totalorder %s238_s14, %s1237_s12  ;;  %p1246_p0 = scmp.lt.s32.totalorder %s1237_s12, %s1237_s12 }
  0x61   : > { %p1240_p7 = pnand %p1238_p5, %p1474_p13  ;;  %p1247_p1 = por %p1246_p0, %p1245_p12 }
  0x63   : > { %p1241_p9 = pneg %p1240_p7 }
  0x65   : > { %p1248_p2 = pnand %p1247_p1, %p1241_p9 }
  0x67   : > { %1251 = shalt.err (!%p1248_p2)
}
  0x68   : > { %1051 = dma.hbm_to_vmem [thread:$0]  (!%p1458_p11), %s1750_s4, 1024, %s238_s14, [#allocation9], %s1361_s30, %s1361_s30, %s1362_s9  }
  0x69   : > { %s1568_s18 = sadd.s32 1, %s1356_s24   ;;  %s31_s8 = sadd.s32 1, %s1352_s23 }
  0x6a   : > { %s28_s13 = ssub.s32 %s1356_s24, %s1568_s18  ;;  %p38_p13 = scmp.ne.s32.totalorder %s1352_s23, %s1348_s22 }
  0x6b   : > { %p29_p4 = scmp.eq.s32.totalorder %s28_s13, 0  ;;  %p39_p8 = scmp.eq.s32.totalorder %s1356_s24, 0 }
  0x6c   : > { %p1761_p6 = scmp.eq.s32.totalorder %s1428_s25, 1  ;;  %p1064_p3 = scmp.lt.s32.totalorder %s1356_s24, 2 }
  0x6d   : > { %s1584_s16 = scalar_select %p29_p4, %s1352_s23, %s31_s8  }
  0x6e   : > { %p1578_p10 = por %p1761_p6, %p38_p13  ;;  %p40_p5 = por %p39_p8, %p38_p13 }
  0x6f   : > { %s254_s17 = sand.u32 1, %s1352_s23   ;;  %s919_s30 = sshll.u32 %s1356_s24, 8 }
  0x70   : > { %s873_s19 = sshll.u32 %s254_s17, 4  ;;  %s1591_s20 = scalar_lea.hbm %s1746_s0, %s919_s30 }
  0x71   : > { %s258_s26 = scalar_lea.vmem [#allocation2], %s873_s19  ;;  %p1595_p11 = pnand %p1064_p3, %p40_p5 }
  0x72   : > { %s265_s7 = sshll.u32 %s258_s26, 4  ;;  %s1599_s10 = scalar_lea.sflag [#allocation3], %s254_s17  ;;  %s1593_s7 = int_to_ptr.vmem [resolvable:$true] %s265_s7 }
  0x73   : > { %s1252_s11 = scalar_lea.hbm %s1591_s20, 256  ;;  %p1254_p9 = pneg %p1595_p11 }
  0x74   : > { %p1253_p7 = scmp.ne.s32.totalorder %s1591_s20, %s1252_s11  ;;  %s1257_s19 = scalar_lea.hbm %s1746_s0, 512 }
  0x75   : > { %p1258_p1 = scmp.lt.u32.totalorder %s1591_s20, %s1746_s0  ;;  %p1259_p2 = scmp.lt.u32.totalorder %s1257_s19, %s1252_s11 }
  0x76   : > { %p1255_p12 = pnand %p1254_p9, %p1253_p7  ;;  %p1261_p4 = scmp.lt.u32.totalorder %s1252_s11, %s1591_s20 }
  0x77   : > { %p1260_p13 = por %p1259_p2, %p1258_p1 }
  0x78   : > { %p1256_p0 = pneg %p1255_p12 }
  0x79   : > { %p1262_p8 = por %p1261_p4, %p1260_p13 }
  0x7b   : > { %p1263_p6 = pnand %p1262_p8, %p1256_p0 }
  0x7d   : > { %1266 = shalt.err (!%p1263_p6)
}
  0x7e   : > { %s1267_s17 = scalar_lea.vmem %s1593_s7, 256  ;;  %s1364_s14 = smov [#allocation2]  }
  0x7f   : > { %p1268_p3 = scmp.ne.s32.totalorder %s1593_s7, %s1267_s17  ;;  %s1272_s26 = sshll.u32 %s1364_s14, 4  ;;  %s1273_s26 = int_to_ptr.vmem [resolvable:$false] %s1272_s26 }
  0x80   : > { %s1274_s8 = scalar_lea.vmem %s1273_s26, 512  ;;  %p1275_p12 = scmp.lt.s32.totalorder %s1593_s7, %s1273_s26 }
  0x81   : > { %p1270_p5 = pnand %p1268_p3, %p1254_p9  ;;  %p1276_p1 = scmp.lt.s32.totalorder %s1274_s8, %s1267_s17 }
  0x83   : > { %p1271_p7 = pneg %p1270_p5  ;;  %p1277_p2 = por %p1276_p1, %p1275_p12 }
  0x85   : > { %p1278_p13 = pnand %p1277_p2, %p1271_p7 }
  0x87   : > { %1281 = shalt.err (!%p1278_p13)
}
  0x88   : > { %s1365_s11 = smov 128   ;;  %s1366_s13 = smov 8  }
  0x89   : > { %1055 = dma.hbm_to_vmem [thread:$0]  (!%p1595_p11), %s1591_s20, 256, %s1593_s7, %s1599_s10, %s1365_s11, %s1365_s11, %s1366_s13  }
  0x8a   : > { %p1764_p9 = scmp.ne.s32.totalorder %s1758_s29, 0 }
  0x8b   : > { %s1630_s19 = sand.u32 (!%p1764_p9), 1, %s1348_s22   ;;  %p1765_p0 = scmp.ne.s32.totalorder (!%p1764_p9), %s1756_s27, 0 }
  0x8c   : > { %277 = sbr.rel (%p1764_p9) target bundleno = 1056 (0x420), region = 44  ;;  %s877_s30 = sshll.u32 (!%p1764_p9), %s1630_s19, 4 }
  0x8d   : > { %s280_s9 = scalar_lea.sflag (!%p1764_p9), [#allocation3], %s1630_s19  ;;  %s283_s17 = scalar_lea.vmem (!%p1764_p9), [#allocation2], %s877_s30 }
  0x93   : > { %1327 = dma.done.wait (%p1765_p0), %s280_s9, 256  }
  0x94   : > { %1329 = vsyncadd (%p1765_p0), %s280_s9, 4294967040  ;;  %p1766_p11 = scmp.eq.s32.totalorder %s1428_s25, 0 }
  0x96   : > { %1331 = dma.done.wait (%p1766_p11), [#allocation6], 1280   ;;  %p1767_p4 = pmov %p1766_p11 }
  0x98   : > { %1333 = vsyncadd (%p1767_p4), [#allocation6], 4294966016  ;;  %p1768_p8 = pmov %p1767_p4 }
  0x99   : > { %p1769_p6 = pmov %p1767_p4 }
  0x9a   : > { %1335 = dma.done.wait (%p1768_p8), [#allocation9], 2048  }
  0x9b   : > { %1337 = vsyncadd (%p1769_p6), [#allocation9], 4294965248  ;;  %v1367_v0 = vmov 0.0   ;;  %vm1368_vm0 = vmmov 0   ;;  %v1114_v1 = vld [vmem:[#allocation5] sm:$0xff]   ;;  %v1115_v2 = vld [vmem:[#allocation5 + $0x8] sm:$0xff]  }
  0x9c   : > { %951 = vmatprep.subr.bf16.mxu0 %v1367_v0  ;;  %955 = vmatprep.mubr.msk.bf16.mxu0 %vm1368_vm0, %v1367_v0  ;;  %v331_v3 = vld [vmem:[%s283_s17] sm:$0xff]  ;;  %v332_v4 = vld [vmem:[%s283_s17 + $0x8] sm:$0xff]  ;;  %vm355_vm1 = vcmask 261120   ;;  %s327_s8 = scalar_lea.vmem [#allocation11], %s877_s30  ;;  %s920_s13 = sshll.u32 %s1428_s25, 8 }
  0x9d   : > { %959 = vmatprep.subr.bf16.mxu1 %v1367_v0  ;;  %975 = vmatprep.mubr.msk.bf16.mxu1 %vm1368_vm0, %v1367_v0  ;;  %v1116_v5 = vld [vmem:[#allocation7] sm:$0xff]   ;;  %v333_v6 = vpack.c.bf16 %v332_v4, %v331_v3  ;;  %v1117_v7 = vld [vmem:[#allocation7 + $0x8] sm:$0xff]   ;;  %v1118_v8 = vld [vmem:[#allocation7 + $0x10] sm:$0xff]   ;;  %s755_s11 = sshll.u32 %s327_s8, 4  ;;  %s1702_s27 = scalar_lea.hbm %s1752_s6, %s920_s13  ;;  %s1697_s11 = int_to_ptr.vmem [resolvable:$true] %s755_s11 }
  0x9e   : > { %952 = vmatpush3.bf16.msra.mxu0 %v1114_v1  ;;  %960 = vmatpush3.bf16.msra.mxu1 %v1116_v5  ;;  %v1119_v9 = vld [vmem:[#allocation7 + $0x18] sm:$0xff]   ;;  %v1120_v10 = vld [vmem:[#allocation7 + $0x20] sm:$0xff]   ;;  %v1121_v11 = vld [vmem:[#allocation7 + $0x28] sm:$0xff]   ;;  %s742_s30 = scalar_lea.sflag [#allocation4], %s1630_s19  ;;  %s1282_s25 = scalar_lea.vmem %s1697_s11, 256 }
  0x9f   : > { %953 = vmatprep.subr.bf16.mxu0 %v1367_v0  ;;  %961 = vmatprep.subr.bf16.mxu1 %v1367_v0  ;;  %v1122_v12 = vld [vmem:[#allocation7 + $0x30] sm:$0xff]   ;;  %v1123_v13 = vld [vmem:[#allocation7 + $0x38] sm:$0xff]   ;;  %v1124_v14 = vld [vmem:[#allocation8] sm:$0xff]   ;;  %p1283_p3 = scmp.ne.s32.totalorder %s1697_s11, %s1282_s25  ;;  %s1369_s29 = smov [#allocation11]  }
  0xa0   : > { %v1125_v15 = vld [vmem:[#allocation8 + $0x8] sm:$0xff]   ;;  %v1126_v16 = vld [vmem:[#allocation8 + $0x10] sm:$0xff]   ;;  %v1127_v17 = vld [vmem:[#allocation8 + $0x18] sm:$0xff]   ;;  %s1286_s20 = sshll.u32 %s1369_s29, 4  ;;  %s1287_s20 = int_to_ptr.vmem [resolvable:$false] %s1286_s20 }
  0xa1   : > { %v1128_v18 = vld [vmem:[#allocation8 + $0x20] sm:$0xff]   ;;  %v1129_v19 = vld [vmem:[#allocation8 + $0x28] sm:$0xff]   ;;  %v883_v20 = vld [vmem:[%s1751_s5] ss:$0 sm:$0xff]  ;;  %p1284_p5 = pnand %p1283_p3, %p1578_p10  ;;  %s1288_s7 = scalar_lea.vmem %s1287_s20, 512 }
  0xa2   : > { %954 = vmatpush3.bf16.msra.mxu0 %v1115_v2  ;;  %962 = vmatpush3.bf16.msra.mxu1 %v1117_v7  ;;  %v1130_v30 = vld [vmem:[#allocation8 + $0x30] sm:$0xff]   ;;  %v1131_v31 = vld [vmem:[#allocation8 + $0x38] sm:$0xff]   ;;  %v1132_v32 = vld [vmem:[#allocation10] sm:$0xff]   ;;  %p1289_p12 = scmp.lt.s32.totalorder %s1697_s11, %s1287_s20  ;;  %p1290_p1 = scmp.lt.s32.totalorder %s1288_s7, %s1282_s25 }
  0xa3   : > { %979 = vmatprep.subr.bf16.mxu0 %v1367_v0  ;;  %963 = vmatprep.subr.bf16.mxu1 %v1367_v0  ;;  %v1133_v33 = vld [vmem:[#allocation10 + $0x8] sm:$0xff]   ;;  %v1134_v34 = vld [vmem:[#allocation10 + $0x10] sm:$0xff]   ;;  %v1135_v35 = vld [vmem:[#allocation10 + $0x18] sm:$0xff]   ;;  %p1285_p7 = pneg %p1284_p5 }
  0xa4   : > { %v1136_v36 = vld [vmem:[#allocation10 + $0x20] sm:$0xff]   ;;  %v1137_v37 = vld [vmem:[#allocation10 + $0x28] sm:$0xff]   ;;  %v887_v38 = vld [vmem:[%s1751_s5 + $0x1] ss:$0 sm:$0xff]  ;;  %p1291_p2 = por %p1290_p1, %p1289_p12 }
  0xa5   : > { %956 = vmatmul.mubr.msk.bf16.vlgmr.msra.gmra.mrb[0].mxu0 %vm355_vm1, %v333_v6  ;;  %v1138_v48 = vld [vmem:[#allocation10 + $0x30] sm:$0xff]   ;;  %v1139_v49 = vld [vmem:[#allocation10 + $0x38] sm:$0xff]  }
  0xa6   : > { %995 = vmatprep.mubr.msk.bf16.mxu0 %vm1368_vm0, %v1367_v0  ;;  %964 = vmatpush3.bf16.msra.mxu1 %v1118_v8  ;;  %v896_v50 = vld [vmem:[%s1751_s5 + $0x2] ss:$0 sm:$0xff]  ;;  %v905_v60 = vld [vmem:[%s1751_s5 + $0x3] ss:$0 sm:$0xff]  ;;  %p1292_p13 = pnand %p1291_p2, %p1285_p7 }
  0xa7   : > { %965 = vmatprep.subr.bf16.mxu1 %v1367_v0  ;;  %980 = vmatpush3.bf16.msra.mxu0 %v1124_v14 }
  0xa8   : > { %981 = vmatprep.subr.bf16.mxu0 %v1367_v0 }
  0xaa   : > { %966 = vmatpush3.bf16.msra.mxu1 %v1119_v9 }
  0xab   : > { %967 = vmatprep.subr.bf16.mxu1 %v1367_v0  ;;  %982 = vmatpush3.bf16.msra.mxu0 %v1125_v15 }
  0xac   : > { %983 = vmatprep.subr.bf16.mxu0 %v1367_v0 }
  0xae   : > { %968 = vmatpush3.bf16.msra.mxu1 %v1120_v10 }
  0xaf   : > { %969 = vmatprep.subr.bf16.mxu1 %v1367_v0  ;;  %984 = vmatpush3.bf16.msra.mxu0 %v1126_v16 }
  0xb0   : > { %985 = vmatprep.subr.bf16.mxu0 %v1367_v0 }
  0xb2   : > { %970 = vmatpush3.bf16.msra.mxu1 %v1121_v11 }
  0xb3   : > { %971 = vmatprep.subr.bf16.mxu1 %v1367_v0  ;;  %986 = vmatpush3.bf16.msra.mxu0 %v1127_v17 }
  0xb4   : > { %987 = vmatprep.subr.bf16.mxu0 %v1367_v0 }
  0xb6   : > { %972 = vmatpush3.bf16.msra.mxu1 %v1122_v12 }
  0xb7   : > { %973 = vmatprep.subr.bf16.mxu1 %v1367_v0  ;;  %988 = vmatpush3.bf16.msra.mxu0 %v1128_v18 }
  0xb8   : > { %989 = vmatprep.subr.bf16.mxu0 %v1367_v0 }
  0xba   : > { %974 = vmatpush3.bf16.msra.mxu1 %v1123_v13 }
  0xbb   : > { %999 = vmatprep.subr.bf16.mxu1 %v1367_v0  ;;  %990 = vmatpush3.bf16.msra.mxu0 %v1129_v19 }
  0xbc   : > { %991 = vmatprep.subr.bf16.mxu0 %v1367_v0 }
  0xbf   : > { %992 = vmatpush3.bf16.msra.mxu0 %v1130_v30 }
  0xc0   : > { %993 = vmatprep.subr.bf16.mxu0 %v1367_v0 }
  0xc3   : > { %994 = vmatpush3.bf16.msra.mxu0 %v1131_v31 }
 0x178   : > { %v393_v21 = vpop.f32.mrb[0].mxu0 }
 0x179   : > { %v394_v22 = vadd.f32 %v883_v20, %v393_v21  ;;  %v957_v23 = vpop.f32.mrb[1].mxu0 }
 0x17a   : > { %v396_v24 = vpop.f32.mrb[2].mxu0 }
 0x17b   : > { %v397_v25 = vadd.f32 %v883_v20, %v396_v24  ;;  %v958_v26 = vpop.f32.mrb[3].mxu0  ;;  %v400_v27 = vmax.f32 %v394_v22, 0.0 }
 0x17d   : > { %v401_v28 = vmax.f32 %v397_v25, 0.0 }
 0x17f   : > { %v402_v29 = vpack.c.bf16 %v401_v28, %v400_v27 }
 0x181   : > { %976 = vmatmul.mubr.bf16.vlgmr.msra.gmra.mrb[0].mxu1 %v402_v29 }
 0x182   : > { %1015 = vmatprep.mubr.msk.bf16.mxu1 %vm1368_vm0, %v1367_v0  ;;  %1000 = vmatpush3.bf16.msra.mxu1 %v1132_v32 }
 0x183   : > { %1001 = vmatprep.subr.bf16.mxu1 %v1367_v0 }
 0x186   : > { %1002 = vmatpush3.bf16.msra.mxu1 %v1133_v33 }
 0x187   : > { %1003 = vmatprep.subr.bf16.mxu1 %v1367_v0 }
 0x18a   : > { %1004 = vmatpush3.bf16.msra.mxu1 %v1134_v34 }
 0x18b   : > { %1005 = vmatprep.subr.bf16.mxu1 %v1367_v0 }
 0x18e   : > { %1006 = vmatpush3.bf16.msra.mxu1 %v1135_v35 }
 0x18f   : > { %1007 = vmatprep.subr.bf16.mxu1 %v1367_v0 }
 0x192   : > { %1008 = vmatpush3.bf16.msra.mxu1 %v1136_v36 }
 0x193   : > { %1009 = vmatprep.subr.bf16.mxu1 %v1367_v0 }
 0x196   : > { %1010 = vmatpush3.bf16.msra.mxu1 %v1137_v37 }
 0x197   : > { %1011 = vmatprep.subr.bf16.mxu1 %v1367_v0 }
 0x19a   : > { %1012 = vmatpush3.bf16.msra.mxu1 %v1138_v48 }
 0x19b   : > { %1013 = vmatprep.subr.bf16.mxu1 %v1367_v0 }
 0x19e   : > { %1014 = vmatpush3.bf16.msra.mxu1 %v1139_v49 }
 0x254   : > { %v506_v39 = vpop.f32.mrb[0].mxu1 }
 0x255   : > { %v507_v40 = vadd.f32 %v887_v38, %v506_v39  ;;  %v977_v41 = vpop.f32.mrb[1].mxu1 }
 0x256   : > { %v509_v42 = vpop.f32.mrb[2].mxu1 }
 0x257   : > { %v510_v43 = vadd.f32 %v887_v38, %v509_v42  ;;  %v978_v44 = vpop.f32.mrb[3].mxu1  ;;  %v513_v45 = vmax.f32 %v507_v40, 0.0 }
 0x259   : > { %v514_v46 = vmax.f32 %v510_v43, 0.0 }
 0x25b   : > { %v515_v47 = vpack.c.bf16 %v514_v46, %v513_v45 }
 0x25d   : > { %996 = vmatmul.mubr.bf16.vlgmr.msra.gmra.mrb[4].mxu0 %v515_v47 }
 0x330   : > { %v619_v51 = vpop.f32.mrb[4].mxu0 }
 0x331   : > { %v620_v52 = vadd.f32 %v896_v50, %v619_v51  ;;  %v997_v53 = vpop.f32.mrb[5].mxu0 }
 0x332   : > { %v622_v54 = vpop.f32.mrb[6].mxu0 }
 0x333   : > { %v623_v55 = vadd.f32 %v896_v50, %v622_v54  ;;  %v998_v56 = vpop.f32.mrb[7].mxu0  ;;  %v626_v57 = vmax.f32 %v620_v52, 0.0 }
 0x335   : > { %v627_v58 = vmax.f32 %v623_v55, 0.0 }
 0x337   : > { %v628_v59 = vpack.c.bf16 %v627_v58, %v626_v57 }
 0x339   : > { %1016 = vmatmul.mubr.bf16.vlgmr.msra.gmra.mrb[4].mxu1 %v628_v59 }
 0x40c   : > { %v732_v61 = vpop.f32.mrb[4].mxu1 }
 0x40d   : > { %v733_v62 = vadd.f32 %v905_v60, %v732_v61  ;;  %v1017_v63 = vpop.f32.mrb[5].mxu1 }
 0x40e   : > { %v735_v0 = vpop.f32.mrb[6].mxu1 }
 0x40f   : > { %739 = vst [vmem:[%s327_s8] sm:$0xff] %v733_v62  ;;  %v736_v1 = vadd.f32 %v905_v60, %v735_v0  ;;  %v1018_v2 = vpop.f32.mrb[7].mxu1 }
 0x411   : > { %740 = vst [vmem:[%s327_s8 + $0x8] sm:$0xff] %v736_v1 }
 0x412   : > { %1295 = shalt.err (!%p1292_p13)
}
 0x413   : > { %s1296_s12 = scalar_lea.hbm %s1702_s27, 256  ;;  %s1300_s26 = scalar_lea.hbm %s1752_s6, 512 }
 0x414   : > { %p1297_p9 = scmp.ne.s32.totalorder %s1702_s27, %s1296_s12  ;;  %p1301_p4 = scmp.lt.u32.totalorder %s1702_s27, %s1752_s6 }
 0x415   : > { %p1302_p8 = scmp.lt.u32.totalorder %s1300_s26, %s1296_s12  ;;  %p1304_p3 = scmp.lt.u32.totalorder %s1296_s12, %s1702_s27 }
 0x416   : > { %p1298_p0 = pnand %p1297_p9, %p1578_p10 }
 0x417   : > { %p1303_p6 = por %p1302_p8, %p1301_p4 }
 0x418   : > { %p1299_p11 = pneg %p1298_p0 }
 0x419   : > { %p1305_p5 = por %p1304_p3, %p1303_p6 }
 0x41b   : > { %p1306_p7 = pnand %p1305_p5, %p1299_p11 }
 0x41d   : > { %1309 = shalt.err (!%p1306_p7)
}
 0x41e   : > { %s1370_s9 = smov 128   ;;  %s1371_s17 = smov 8  }
 0x41f   : > { %1037 = dma.vmem_to_hbm [thread:$0]  (%p1578_p10), %s1697_s11, 256, %s1702_s27, %s742_s30, %s1370_s9, %s1370_s9, %s1371_s17  }
 0x420 PF: > { %s770_s25 = sand.u32 1, %s1344_s21   ;;  %p1770_p12 = scmp.ne.s32.totalorder %s1757_s28, 0 }
 0x421   : > { %p1771_p1 = scmp.ge.s32.totalorder %s1356_s24, 2  ;;  %s771_s29 = scalar_lea.sflag [#allocation4], %s770_s25 }
 0x423   : > { %p1057_p2 = pnand %p1771_p1, %p1770_p12 }
 0x425   : > { %1339 = dma.done.wait (!%p1057_p2), %s771_s29, 256  }
 0x426   : > { %1341 = vsyncadd (!%p1057_p2), %s771_s29, 4294967040  ;;  %p21_p13 = scmp.ge.s32.totalorder %s1568_s18, 4   ;;  %s1772_s21 = smov %s1348_s22 }
 0x427   : > { %s1773_s22 = smov %s1352_s23  ;;  %s1774_s23 = smov %s1584_s16 }
 0x428   : > { %s1775_s24 = smov %s1568_s18  ;;  %23 = sbr.rel (!%p21_p13) target bundleno = 7 (0x7), region = 105 }
 0x42f   :  { %776 = vsyncpa [#allocation3], 1 }
 0x430   :  { %778 = vsyncpa [#allocation3 + $0x1], 1 }
 0x431   :  { %779 = vsyncpa [#allocation6], 1 }
 0x432   :  { %780 = vsyncpa [#allocation9], 1 }
 0x433   :  { %781 = vsyncpa [#allocation4], 1 }
 0x434   :  { %783 = vsyncpa [#allocation4 + $0x1], 1 }

</bundles_post_ra>
